<compile_context>
chip_gen: v7x
topology: tpu7x:2x2x1
jax: 0.10.0
libtpu: 0.0.40
codegen_flags: <defaults>
</compile_context>

<pallas_src>
import jax
import jax.numpy as jnp
from jax.experimental import pallas as pl
from jax.experimental.pallas import tpu as pltpu


_HIDDEN = 20
_LANE_PAD = 1024  # 8 sublanes x 128 lanes -> fully unmasked vld/vst tiles


def mlp_kernel(x_ref, w1_ref, b1_ref, w2_ref, b2_ref, o_ref):
    # Lane-major: batch N lives on the lane (last) axis.
    x = x_ref[...]        # (1, Np)   f32, lane-dense
    w1 = w1_ref[...]      # (H, 1)    hidden.weight   (torch (out,in) layout)
    b1 = b1_ref[...]      # (H, 1)    hidden.bias
    w2 = w2_ref[...]      # (H, 1)    predict.weight, stored as a column
    b2 = b2_ref[0]        # scalar from SMEM -> sreg broadcast

    # Layer 1: Linear(1, H).  K == 1, so an MXU matmul would be >99% zero
    # padding; do it as a pure VPU broadcast outer product instead.
    h = jnp.maximum(w1 * x + b1, 0.0)                   # (H, Np)

    # Layer 2: Linear(H, 1).  Output dim == 1, so again skip the MXU:
    # elementwise multiply + 20-element cross-sublane reduce (XLU slot).
    y = jnp.sum(w2 * h, axis=0, keepdims=True) + b2     # (1, Np)

    o_ref[...] = y.astype(o_ref.dtype)


def net_forward(x, w1, b1, w2, b2):
    """Forward pass of Net.

    x : (N, 1) f32  input column (as in the PyTorch script)
    w1: (H, 1) f32  hidden.weight  (PyTorch (out_features, in_features))
    b1: (H,)   f32  hidden.bias
    w2: (1, H) f32  predict.weight
    b2: (1,)   f32  predict.bias
    returns (N, 1) f32
    """
    n = x.shape[0]
    h = w1.shape[0]
    n_pad = ((n + _LANE_PAD - 1) // _LANE_PAD) * _LANE_PAD

    # Lane-major re-layout: batch on the lane axis, zero-padded so the kernel
    # only sees full (8,128)-aligned tiles.  Padded lanes compute garbage that
    # is sliced off below.
    x_lane = jnp.zeros((1, n_pad), jnp.float32).at[0, :n].set(x[:, 0])
    w1_col = w1.reshape(h, 1).astype(jnp.float32)
    b1_col = b1.reshape(h, 1).astype(jnp.float32)
    w2_col = w2.reshape(h, 1).astype(jnp.float32)   # (1,H) -> column (H,1)
    b2_s = b2.reshape(1).astype(jnp.float32)

    vmem = pl.BlockSpec(memory_space=pltpu.MemorySpace.VMEM)
    smem = pl.BlockSpec(memory_space=pltpu.MemorySpace.SMEM)

    y_lane = pl.pallas_call(
        mlp_kernel,
        out_shape=jax.ShapeDtypeStruct((1, n_pad), jnp.float32),
        in_specs=[vmem, vmem, vmem, vmem, smem],
        out_specs=vmem,
    )(x_lane, w1_col, b1_col, w2_col, b2_s)

    # Back to the PyTorch (N, 1) layout.
    return y_lane[0, :n][:, None]


def init_params(key):
    """Deterministic init mimicking nn.Linear's uniform(-1/sqrt(fan_in), +),
    with parameters kept in the PyTorch (out_features, in_features) layout."""
    k1, k2, k3, k4 = jax.random.split(key, 4)
    bound1 = 1.0                               # hidden: fan_in = 1
    w1 = jax.random.uniform(k1, (_HIDDEN, 1), jnp.float32, -bound1, bound1)
    b1 = jax.random.uniform(k2, (_HIDDEN,), jnp.float32, -bound1, bound1)
    bound2 = 1.0 / jnp.sqrt(float(_HIDDEN))    # predict: fan_in = 20
    w2 = jax.random.uniform(k3, (1, _HIDDEN), jnp.float32, -bound2, bound2)
    b2 = jax.random.uniform(k4, (1,), jnp.float32, -bound2, bound2)
    return w1, b1, w2, b2


if __name__ == "__main__":
    key = jax.random.PRNGKey(0)
    w1, b1, w2, b2 = init_params(key)

    # Same input construction as the PyTorch script: 1000 points in [-1, 1].
    n = 1000
    x = jnp.expand_dims(jnp.linspace(-1.0, 1.0, n, dtype=jnp.float32), axis=1)

    out = jax.block_until_ready(net_forward(x, w1, b1, w2, b2))

    # Pure-JAX reference (standard row-major formulation).
    ref = jnp.maximum(x @ w1.T + b1[None, :], 0.0) @ w2.T + b2[None, :]
    assert out.shape == (n, 1)
    assert jnp.allclose(out, ref, atol=1e-5, rtol=1e-5)

    print("KERNEL_OK")
</pallas_src>

<mosaic_0001>
module attributes {stable_mosaic.version = 11 : i64} {
  func.func @mlp_kernel(%arg0: memref<1x1024xf32, #tpu.memory_space<vmem>>, %arg1: memref<20x1xf32, #tpu.memory_space<vmem>>, %arg2: memref<20x1xf32, #tpu.memory_space<vmem>>, %arg3: memref<20x1xf32, #tpu.memory_space<vmem>>, %arg4: memref<1xf32, #tpu.memory_space<smem>>, %arg5: memref<1x1024xf32, #tpu.memory_space<vmem>>) attributes {dimension_semantics = [], scalar_prefetch = 0 : i64, scratch_operands = 0 : i64, tpu.core_type = #tpu.core_type<tc>} {
    %c0 = arith.constant 0 : index
    %c0_0 = arith.constant 0 : index
    %0 = vector.load %arg0[%c0, %c0_0] : memref<1x1024xf32, #tpu.memory_space<vmem>>, vector<1x1024xf32>
    %c0_1 = arith.constant 0 : index
    %c0_2 = arith.constant 0 : index
    %1 = vector.load %arg1[%c0_1, %c0_2] : memref<20x1xf32, #tpu.memory_space<vmem>>, vector<20x1xf32>
    %c0_3 = arith.constant 0 : index
    %c0_4 = arith.constant 0 : index
    %2 = vector.load %arg2[%c0_3, %c0_4] : memref<20x1xf32, #tpu.memory_space<vmem>>, vector<20x1xf32>
    %c0_5 = arith.constant 0 : index
    %c0_6 = arith.constant 0 : index
    %3 = vector.load %arg3[%c0_5, %c0_6] : memref<20x1xf32, #tpu.memory_space<vmem>>, vector<20x1xf32>
    %c0_7 = arith.constant 0 : index
    %4 = memref.load %arg4[%c0_7] : memref<1xf32, #tpu.memory_space<smem>>
    %5 = vector.broadcast %1 : vector<20x1xf32> to vector<20x1024xf32>
    %6 = vector.broadcast %0 : vector<1x1024xf32> to vector<20x1024xf32>
    %7 = arith.mulf %5, %6 : vector<20x1024xf32>
    %8 = vector.broadcast %2 : vector<20x1xf32> to vector<20x1024xf32>
    %9 = arith.addf %7, %8 : vector<20x1024xf32>
    %cst = arith.constant 0.000000e+00 : f32
    %10 = vector.broadcast %cst : f32 to vector<20x1024xf32>
    %11 = arith.maximumf %9, %10 : vector<20x1024xf32>
    %12 = vector.broadcast %3 : vector<20x1xf32> to vector<20x1024xf32>
    %13 = arith.mulf %12, %11 : vector<20x1024xf32>
    %cst_8 = arith.constant dense<0.000000e+00> : vector<1024xf32>
    %14 = vector.multi_reduction <add>, %13, %cst_8 [0] : vector<20x1024xf32> to vector<1024xf32>
    %15 = vector.shape_cast %14 : vector<1024xf32> to vector<1x1024xf32>
    %16 = vector.broadcast %4 : f32 to vector<1x1024xf32>
    %17 = arith.addf %15, %16 : vector<1x1024xf32>
    %c0_9 = arith.constant 0 : index
    %c0_10 = arith.constant 0 : index
    %18 = vector.load %arg5[%c0_9, %c0_10] : memref<1x1024xf32, #tpu.memory_space<vmem>>, vector<1x1024xf32>
    tpu.vector_store %arg5[%c0_9, %c0_10], %17 {strides = array<i32>} : memref<1x1024xf32, #tpu.memory_space<vmem>>, vector<1x1024xf32>,
    return
  }
}

</mosaic_0001>

<bundles_post_ra>
// kernel: tpu_custom_call.1
= control target key start
LH: loop header
LB: loop body
LE: loop exit
PB: predicated region body
PF: predicated region fallthrough
CT: control target
= control target key end

     0   :  { %v399_v2 = vmov 0   ;;  %s527_s0 = inlined_call_operand.vmem [shape: f32[1,1024], index: 0, kind: input, shape index: {}]   ;;  %s528_s1 = inlined_call_operand.vmem [shape: f32[20,1], index: 1, kind: input, shape index: {}]   ;;  %s529_s2 = inlined_call_operand.vmem [shape: f32[20,1], index: 2, kind: input, shape index: {}]   ;;  %s530_s3 = inlined_call_operand.vmem [shape: f32[20,1], index: 3, kind: input, shape index: {}]   ;;  %s531_s4 = inlined_call_operand.<no memory space> [shape: f32[1], index: 4, kind: input, shape index: {}]   ;;  %s532_s5 = inlined_call_operand.hbm [shape: f32[1,1024], index: 5, kind: output, shape index: {}]  }
   0x1   :  { %v25_v0 = vld [vmem:[%s528_s1 + $0x10] sm:$0xf]  ;;  %v23_v1 = vld [vmem:[%s528_s1] sm:$0xff]  ;;  %374 = vset.pattern.permute.xlu1 %v399_v2  ;;  %373 = vset.pattern.permute.xlu0 %v399_v2  ;;  %v24_v4 = vld [vmem:[%s528_s1 + $0x8] sm:$0xff] }
   0x2   :  { %45 = vperm.xlu1 %374, %v25_v0   ;;  %35 = vperm.xlu0 %373, %v23_v1   ;;  %v26_v3 = vld [vmem:[%s529_s2] sm:$0xff] }
   0x3   :  { %11 = vsyncpa [#allocation4], 0  ;;  %v28_v5 = vld [vmem:[%s529_s2 + $0x10] sm:$0xf]  ;;  %v27_v6 = vld [vmem:[%s529_s2 + $0x8] sm:$0xff]  ;;  %v49_v10 = vlaneseq  ;;  %v465_v34 = vstv %s531_s4  ;;  %vm216_vm0 = vcmask 1043456  }
   0x4   :  { %v30_v7 = vld [vmem:[%s530_s3 + $0x8] sm:$0xff]  ;;  %v29_v8 = vld [vmem:[%s530_s3] sm:$0xff]  ;;  %v31_v9 = vld [vmem:[%s530_s3 + $0x10] sm:$0xf]  ;;  %v400_v12 = vmov 1966171168  }
   0x5   :  { %v50_v11 = vshrl.u32 %v49_v10, 7  ;;  %v310_v13 = vunpack.c.l.s4 %v400_v12  ;;  %v22_v20 = vld [vmem:[%s527_s0] sm:$0xff]  ;;  %s401_s0 = smov [#allocation3]  }
   0x6   :  { %115 = vperm.xlu1 %374, %v26_v3   ;;  %40 = vperm.xlu0 %373, %v24_v4   ;;  %s362_s4 = sshll.u32 %s401_s0, 4  ;;  %s363_s4 = int_to_ptr.vmem [resolvable:$true] %s362_s4 }
   0x7   :  { %v51_v14 = vsub.s32 0, %v50_v11  ;;  %v55_v15 = vsub.s32 1, %v50_v11  ;;  %v59_v16 = vsub.s32 2, %v50_v11  ;;  %v63_v17 = vsub.s32 3, %v50_v11  ;;  %s375_s12 = scalar_lea.vmem %s363_s4, 128  ;;  %p380_p1 = scmp.lt.s32.totalorder %s363_s4, %s363_s4 }
   0x8   :  { %v67_v18 = vsub.s32 4, %v50_v11  ;;  %v71_v19 = vsub.s32 5, %v50_v11  ;;  %v75_v21 = vsub.s32 6, %v50_v11  ;;  %v79_v22 = vsub.s32 7, %v50_v11  ;;  %p376_p0 = scmp.ne.s32.totalorder %s363_s4, %s375_s12  ;;  %p381_p2 = scmp.lt.s32.totalorder %s375_s12, %s375_s12 }
   0x9   :  { %v311_v23 = vunpack.c.0.s8 %v310_v13  ;;  %v52_v24 = vrot.slane %v22_v20, %v51_v14  ;;  %v56_v25 = vrot.slane %v22_v20, %v55_v15  ;;  %v60_v26 = vrot.slane %v22_v20, %v59_v16 }
   0xa   :  { %125 = vperm.xlu1 %374, %v28_v5   ;;  %120 = vperm.xlu0 %373, %v27_v6   ;;  %v64_v27 = vrot.slane %v22_v20, %v63_v17  ;;  %v68_v28 = vrot.slane %v22_v20, %v67_v18  ;;  %v72_v29 = vrot.slane %v22_v20, %v71_v19  ;;  %p382_p3 = por %p381_p2, %p380_p1 }
   0xb   :  { %v76_v31 = vrot.slane %v22_v20, %v75_v21  ;;  %v80_v32 = vrot.slane %v22_v20, %v79_v22  ;;  %v467_v35 = vsub.s32 %v311_v23, %v50_v11 }
   0xc   :  { %p383_p4 = pnand %p382_p3, %p376_p0 }
   0xe   :  { %183 = vperm.xlu1 %374, %v30_v7   ;;  %178 = vperm.xlu0 %373, %v29_v8  }
  0x12   :  { %188 = vperm.xlu0 %373, %v31_v9  }
  0x81   :  { %v46_v30 = vpop.permute.xlu1 %45  ;;  %v36_v33 = vpop.permute.xlu0 %35 }
  0x82   :  { %v469_v36 = vmul.f32 %v52_v24, %v46_v30  ;;  %v471_v37 = vmul.f32 %v56_v25, %v46_v30  ;;  %v473_v38 = vmul.f32 %v60_v26, %v46_v30  ;;  %v475_v39 = vmul.f32 %v64_v27, %v46_v30 }
  0x83   :  { %v477_v40 = vmul.f32 %v68_v28, %v46_v30  ;;  %v479_v41 = vmul.f32 %v72_v29, %v46_v30  ;;  %v481_v42 = vmul.f32 %v76_v31, %v46_v30  ;;  %v483_v43 = vmul.f32 %v80_v32, %v46_v30 }
  0x84   :  { %v89_v44 = vmul.f32 %v52_v24, %v36_v33  ;;  %v90_v45 = vmul.f32 %v56_v25, %v36_v33  ;;  %v91_v46 = vmul.f32 %v60_v26, %v36_v33  ;;  %v92_v47 = vmul.f32 %v64_v27, %v36_v33 }
  0x85   :  { %v93_v48 = vmul.f32 %v68_v28, %v36_v33  ;;  %v94_v49 = vmul.f32 %v72_v29, %v36_v33  ;;  %v95_v50 = vmul.f32 %v76_v31, %v36_v33  ;;  %v96_v51 = vmul.f32 %v80_v32, %v36_v33  ;;  %v116_v52 = vpop.permute.xlu1 %115  ;;  %v41_v53 = vpop.permute.xlu0 %40 }
  0x86   :  { %v128_v54 = vadd.f32 %v116_v52, %v89_v44  ;;  %v129_v55 = vadd.f32 %v116_v52, %v90_v45  ;;  %v130_v56 = vadd.f32 %v116_v52, %v91_v46  ;;  %v131_v57 = vadd.f32 %v116_v52, %v92_v47 }
  0x87   :  { %v132_v58 = vadd.f32 %v116_v52, %v93_v48  ;;  %v133_v59 = vadd.f32 %v116_v52, %v94_v49  ;;  %v134_v60 = vadd.f32 %v116_v52, %v95_v50  ;;  %v135_v61 = vadd.f32 %v116_v52, %v96_v51 }
  0x88   :  { %v152_v62 = vmax.f32 %v128_v54, 0.0  ;;  %v153_v63 = vmax.f32 %v129_v55, 0.0  ;;  %v154_v0 = vmax.f32 %v130_v56, 0.0  ;;  %v155_v1 = vmax.f32 %v131_v57, 0.0 }
  0x89   :  { %v156_v2 = vmax.f32 %v132_v58, 0.0  ;;  %v157_v3 = vmax.f32 %v133_v59, 0.0  ;;  %v158_v4 = vmax.f32 %v134_v60, 0.0  ;;  %v159_v5 = vmax.f32 %v135_v61, 0.0  ;;  %v126_v6 = vpop.permute.xlu1 %125  ;;  %v121_v7 = vpop.permute.xlu0 %120 }
  0x8a   :  { %v97_v8 = vmul.f32 %v52_v24, %v41_v53  ;;  %v98_v9 = vmul.f32 %v56_v25, %v41_v53  ;;  %v99_v10 = vmul.f32 %v60_v26, %v41_v53  ;;  %v100_v11 = vmul.f32 %v64_v27, %v41_v53 }
  0x8b   :  { %v101_v12 = vmul.f32 %v68_v28, %v41_v53  ;;  %v102_v13 = vmul.f32 %v72_v29, %v41_v53  ;;  %v103_v14 = vmul.f32 %v76_v31, %v41_v53  ;;  %v104_v15 = vmul.f32 %v80_v32, %v41_v53 }
  0x8c   :  { %v136_v16 = vadd.f32 %v121_v7, %v97_v8  ;;  %v137_v17 = vadd.f32 %v121_v7, %v98_v9  ;;  %v138_v18 = vadd.f32 %v121_v7, %v99_v10  ;;  %v139_v19 = vadd.f32 %v121_v7, %v100_v11 }
  0x8d   :  { %v184_v20 = vpop.permute.xlu1 %183  ;;  %v140_v21 = vadd.f32 %v121_v7, %v101_v12  ;;  %v141_v22 = vadd.f32 %v121_v7, %v102_v13  ;;  %v142_v23 = vadd.f32 %v121_v7, %v103_v14  ;;  %v143_v30 = vadd.f32 %v121_v7, %v104_v15  ;;  %v179_v29 = vpop.permute.xlu0 %178 }
  0x8e   :  { %v160_v33 = vmax.f32 %v136_v16, 0.0  ;;  %v161_v44 = vmax.f32 %v137_v17, 0.0  ;;  %v162_v45 = vmax.f32 %v138_v18, 0.0  ;;  %v163_v24 = vmax.f32 %v139_v19, 0.0 }
  0x8f   :  { %v164_v25 = vmax.f32 %v140_v21, 0.0  ;;  %v165_v26 = vmax.f32 %v141_v22, 0.0  ;;  %v166_v27 = vmax.f32 %v142_v23, 0.0  ;;  %v167_v28 = vmax.f32 %v143_v30, 0.0 }
  0x90   :  { %v199_v31 = vmul.f32 %v184_v20, %v160_v33  ;;  %v200_v32 = vmul.f32 %v184_v20, %v161_v44  ;;  %v201_v46 = vmul.f32 %v184_v20, %v162_v45  ;;  %v202_v47 = vmul.f32 %v184_v20, %v163_v24 }
  0x91   :  { %v203_v48 = vmul.f32 %v184_v20, %v164_v25  ;;  %v204_v49 = vmul.f32 %v184_v20, %v165_v26  ;;  %v205_v50 = vmul.f32 %v184_v20, %v166_v27  ;;  %v206_v51 = vmul.f32 %v184_v20, %v167_v28  ;;  %v189_v9 = vpop.permute.xlu0 %188 }
  0x92   :  { %v191_v52 = vmul.f32 %v179_v29, %v152_v62  ;;  %v192_v53 = vmul.f32 %v179_v29, %v153_v63  ;;  %v193_v54 = vmul.f32 %v179_v29, %v154_v0  ;;  %v194_v55 = vmul.f32 %v179_v29, %v155_v1 }
  0x93   :  { %v195_v56 = vmul.f32 %v179_v29, %v156_v2  ;;  %v196_v57 = vmul.f32 %v179_v29, %v157_v3  ;;  %v197_v58 = vmul.f32 %v179_v29, %v158_v4  ;;  %v198_v59 = vmul.f32 %v179_v29, %v159_v5 }
  0x94   :  { %v144_v60 = vadd.f32 %v126_v6, %v469_v36  ;;  %v145_v61 = vadd.f32 %v126_v6, %v471_v37  ;;  %v146_v7 = vadd.f32 %v126_v6, %v473_v38  ;;  %v147_v8 = vadd.f32 %v126_v6, %v475_v39 }
  0x95   :  { %v148_v10 = vadd.f32 %v126_v6, %v477_v40  ;;  %v149_v62 = vadd.f32 %v126_v6, %v479_v41  ;;  %v150_v63 = vadd.f32 %v126_v6, %v481_v42  ;;  %v151_v0 = vadd.f32 %v126_v6, %v483_v43 }
  0x96   :  { %v168_v1 = vmax.f32 %v144_v60, 0.0  ;;  %v169_v2 = vmax.f32 %v145_v61, 0.0  ;;  %v170_v3 = vmax.f32 %v146_v7, 0.0  ;;  %v171_v4 = vmax.f32 %v147_v8, 0.0 }
  0x97   :  { %v172_v36 = vmax.f32 %v148_v10, 0.0  ;;  %v173_v5 = vmax.f32 %v149_v62, 0.0  ;;  %v174_v37 = vmax.f32 %v150_v63, 0.0  ;;  %v175_v11 = vmax.f32 %v151_v0, 0.0 }
  0x98   :  { %v207_v38 = vmul.f32 %v189_v9, %v168_v1  ;;  %v208_v12 = vmul.f32 %v189_v9, %v169_v2  ;;  %v209_v39 = vmul.f32 %v189_v9, %v170_v3  ;;  %v210_v13 = vmul.f32 %v189_v9, %v171_v4 }
  0x99   :  { %v211_v14 = vmul.f32 %v189_v9, %v172_v36  ;;  %v212_v40 = vmul.f32 %v189_v9, %v173_v5  ;;  %v213_v15 = vmul.f32 %v189_v9, %v174_v37  ;;  %v214_v41 = vmul.f32 %v189_v9, %v175_v11 }
  0x9a   :  { %v215_v16 = vadd.f32 %v199_v31, %v191_v52  ;;  %v217_v42 = vsel %vm216_vm0, %v207_v38, 0.0  ;;  %v225_v43 = vadd.f32 %v200_v32, %v192_v53  ;;  %v226_v6 = vsel %vm216_vm0, %v208_v12, 0.0 }
  0x9b   :  { %v234_v17 = vadd.f32 %v201_v46, %v193_v54  ;;  %v235_v18 = vsel %vm216_vm0, %v209_v39, 0.0  ;;  %v243_v19 = vadd.f32 %v202_v47, %v194_v55  ;;  %v244_v20 = vsel %vm216_vm0, %v210_v13, 0.0 }
  0x9c   :  { %v218_v21 = vadd.f32 %v217_v42, %v215_v16  ;;  %v227_v22 = vadd.f32 %v226_v6, %v225_v43  ;;  %v252_v23 = vadd.f32 %v203_v48, %v195_v56  ;;  %v253_v30 = vsel %vm216_vm0, %v211_v14, 0.0 }
  0x9d   :  { %v236_v33 = vadd.f32 %v235_v18, %v234_v17  ;;  %v245_v44 = vadd.f32 %v244_v20, %v243_v19  ;;  %v261_v45 = vadd.f32 %v204_v49, %v196_v57  ;;  %v262_v24 = vsel %vm216_vm0, %v212_v40, 0.0 }
  0x9e   :  { %v254_v25 = vadd.f32 %v253_v30, %v252_v23  ;;  %v270_v26 = vadd.f32 %v205_v50, %v197_v58  ;;  %v271_v27 = vsel %vm216_vm0, %v213_v15, 0.0  ;;  %v279_v28 = vadd.f32 %v206_v51, %v198_v59 }
  0x9f   :  { %v263_v29 = vadd.f32 %v262_v24, %v261_v45  ;;  %v280_v31 = vsel %vm216_vm0, %v214_v41, 0.0  ;;  %v219_v32 = vrot.slane %v218_v21, 4  ;;  %v228_v46 = vrot.slane %v227_v22, 4 }
  0xa0   :  { %v272_v47 = vadd.f32 %v271_v27, %v270_v26  ;;  %v281_v52 = vadd.f32 %v280_v31, %v279_v28  ;;  %v237_v48 = vrot.slane %v236_v33, 4  ;;  %v246_v53 = vrot.slane %v245_v44, 4 }
  0xa1   :  { %v220_v54 = vadd.f32 %v219_v32, %v218_v21  ;;  %v229_v55 = vadd.f32 %v228_v46, %v227_v22  ;;  %v255_v56 = vrot.slane %v254_v25, 4  ;;  %v264_v49 = vrot.slane %v263_v29, 4 }
  0xa2   :  { %v238_v57 = vadd.f32 %v237_v48, %v236_v33  ;;  %v247_v60 = vadd.f32 %v246_v53, %v245_v44  ;;  %v273_v61 = vrot.slane %v272_v47, 4  ;;  %v282_v50 = vrot.slane %v281_v52, 4 }
  0xa3   :  { %v221_v58 = vrot.slane %v220_v54, 2  ;;  %v230_v7 = vrot.slane %v229_v55, 2  ;;  %v256_v51 = vadd.f32 %v255_v56, %v254_v25  ;;  %v265_v59 = vadd.f32 %v264_v49, %v263_v29 }
  0xa4   :  { %v239_v8 = vrot.slane %v238_v57, 2  ;;  %v248_v9 = vrot.slane %v247_v60, 2  ;;  %v274_v10 = vadd.f32 %v273_v61, %v272_v47  ;;  %v283_v62 = vadd.f32 %v282_v50, %v281_v52 }
  0xa5   :  { %v222_v63 = vadd.f32 %v221_v58, %v220_v54  ;;  %v231_v0 = vadd.f32 %v230_v7, %v229_v55  ;;  %v257_v1 = vrot.slane %v256_v51, 2  ;;  %v266_v2 = vrot.slane %v265_v59, 2 }
  0xa6   :  { %v240_v3 = vadd.f32 %v239_v8, %v238_v57  ;;  %v249_v4 = vadd.f32 %v248_v9, %v247_v60  ;;  %v275_v36 = vrot.slane %v274_v10, 2  ;;  %v284_v5 = vrot.slane %v283_v62, 2 }
  0xa7   :  { %v223_v37 = vrot.slane %v222_v63, 1  ;;  %v232_v11 = vrot.slane %v231_v0, 1  ;;  %v258_v38 = vadd.f32 %v257_v1, %v256_v51  ;;  %v267_v12 = vadd.f32 %v266_v2, %v265_v59 }
  0xa8   :  { %v241_v39 = vrot.slane %v240_v3, 1  ;;  %v250_v13 = vrot.slane %v249_v4, 1  ;;  %v276_v14 = vadd.f32 %v275_v36, %v274_v10  ;;  %v285_v40 = vadd.f32 %v284_v5, %v283_v62 }
  0xa9   :  { %v224_v15 = vadd.f32 %v223_v37, %v222_v63  ;;  %v233_v41 = vadd.f32 %v232_v11, %v231_v0  ;;  %v259_v16 = vrot.slane %v258_v38, 1  ;;  %v268_v42 = vrot.slane %v267_v12, 1 }
  0xaa   :  { %v242_v43 = vadd.f32 %v241_v39, %v240_v3  ;;  %v251_v6 = vadd.f32 %v250_v13, %v249_v4  ;;  %v277_v17 = vrot.slane %v276_v14, 1  ;;  %v286_v18 = vrot.slane %v285_v40, 1 }
  0xab   :  { %v260_v19 = vadd.f32 %v259_v16, %v258_v38  ;;  %v269_v20 = vadd.f32 %v268_v42, %v267_v12  ;;  %v289_v21 = vadd.f32 %v465_v34, %v224_v15  ;;  %v290_v22 = vadd.f32 %v465_v34, %v233_v41 }
  0xac   :  { %v278_v23 = vadd.f32 %v277_v17, %v276_v14  ;;  %v287_v30 = vadd.f32 %v286_v18, %v285_v40  ;;  %v291_v33 = vadd.f32 %v465_v34, %v242_v43  ;;  %v292_v44 = vadd.f32 %v465_v34, %v251_v6 }
  0xad   :  { %v293_v45 = vadd.f32 %v465_v34, %v260_v19  ;;  %v294_v24 = vadd.f32 %v465_v34, %v269_v20  ;;  %v305_v25 = vcombine.low %v289_v21, %v290_v22 }
  0xae   :  { %v295_v26 = vadd.f32 %v465_v34, %v278_v23  ;;  %v296_v27 = vadd.f32 %v465_v34, %v287_v30  ;;  %v306_v28 = vcombine.low %v291_v33, %v292_v44 }
  0xaf   :  { %v307_v29 = vcombine.low %v293_v45, %v294_v24  ;;  %v315_v31 = vrot.slane %v305_v25, %v467_v35 }
  0xb0   :  { %v308_v32 = vcombine.low %v295_v26, %v296_v27  ;;  %v322_v46 = vrot.slane %v306_v28, %v467_v35 }
  0xb1   :  { %v329_v47 = vrot.slane %v307_v29, %v467_v35 }
  0xb2   :  { %v336_v52 = vrot.slane %v308_v32, %v467_v35  ;;  %v337_v48 = vcombine.low %v315_v31, %v322_v46 }
  0xb4   :  { %v338_v53 = vcombine.low %v329_v47, %v336_v52  ;;  %v345_v54 = vrot.slane %v337_v48, %v467_v35 }
  0xb6   :  { %v352_v55 = vrot.slane %v338_v53, %v467_v35 }
  0xb8   :  { %v353_v34 = vcombine.low %v345_v54, %v352_v55 }
  0xba   :  { %355 = vst [vmem:[#allocation3] sm:$0xff] %v353_v34 }
  0xbb   :  { %386 = shalt.err (!%p383_p4)
}
  0xbc   :  { %s387_s15 = scalar_lea.hbm %s532_s5, 128 }
  0xbd   :  { %p388_p5 = scmp.ne.s32.totalorder %s532_s5, %s387_s15  ;;  %p391_p6 = scmp.lt.u32.totalorder %s387_s15, %s532_s5 }
  0xbf   :  { %p393_p7 = pnand %p391_p6, %p388_p5 }
  0xc1   :  { %396 = shalt.err (!%p393_p7)
}
  0xc2   :  { %365 = dma.vmem_to_hbm [thread:$0]  %s363_s4, 128, %s532_s5, [#allocation4]  }
  0xc3   :  { %397 = dma.done.wait [#allocation4], 128  }
  0xc4   :  { %398 = vsyncadd [#allocation4], 4294967168 }
  0xc5   :  { %369 = vsyncpa [#allocation4], 1 }

</bundles_post_ra>
